<compile_context>
chip_gen: v5e
topology: v5e:2x2
jax: 0.10.0
libtpu: 0.0.40
codegen_flags: <defaults>
</compile_context>

<pallas_src>
import jax
import jax.numpy as jnp
from jax.experimental import pallas as pl
from jax.experimental.pallas import tpu as pltpu


def _round_up(n, m):
    return ((n + m - 1) // m) * m


def _u_update_kernel(s_ref, x_ref, y_ref, m_ref, o_ref):
    # s_ref lives in SMEM: [rho1, 0.5/rho1, 4*rho1] in float32.
    rho = s_ref[0]
    half_inv_rho = s_ref[1]
    four_rho = s_ref[2]

    x = x_ref[...]
    y = y_ref[...]
    m = m_ref[...]

    # f32 scalars promote bf16 inputs, so the arithmetic is done in f32.
    t1 = rho * x - m
    out = half_inv_rho * (t1 + jnp.sqrt(t1 * t1 + four_rho * y))
    o_ref[...] = out.astype(o_ref.dtype)


_TILE_ELEMS = 256 * 1024   # ~1 MiB per f32 tile per operand


def u_update(x, y, rho1, M):
    """Pallas implementation of U_Update.forward(x, y, rho1, M)."""
    assert x.shape == y.shape == M.shape
    orig_shape = x.shape
    dtype = x.dtype
    total = x.size

    # Lane-dense flattening: prefer a lane width that divides the total size
    # exactly so the wrapper does zero padding / slicing (no extra HBM copies).
    lane = None
    for cand in (1024, 512, 256, 128):
        if total % cand == 0:
            lane = cand
            break
    needs_pad = lane is None
    if needs_pad:
        lane = 512

    padded_total = _round_up(total, lane) if needs_pad else total
    rows = padded_total // lane

    # Row tile: ~1 MiB f32 per operand tile, sublane-aligned.  If the whole
    # slab is smaller than one tile, use the full row extent (full-dim blocks
    # are exempt from the (8,128) divisibility rule).
    target_tr = max(8, (_TILE_ELEMS // lane) // 8 * 8)
    tr = min(target_tr, rows)

    def to2d(a):
        flat = a.reshape(-1)                      # free (contiguous)
        if needs_pad:
            flat = jnp.pad(flat, (0, padded_total - total))
        return flat.reshape(rows, lane)

    x2, y2, m2 = to2d(x), to2d(y), to2d(M)

    # Scalars stay in float32 regardless of tensor dtype (precision).
    rho = jnp.asarray(rho1, dtype=jnp.float32)
    scalars = jnp.stack([rho, jnp.float32(0.5) / rho, jnp.float32(4.0) * rho])

    grid = (pl.cdiv(rows, tr),)                   # ragged last block is masked
    data_spec = pl.BlockSpec((tr, lane), lambda i: (i, 0))

    # TODO(synk): if the caller donates x's HBM buffer, input_output_aliases
    # could reuse it for the output in the no-pad path.
    out2 = pl.pallas_call(
        _u_update_kernel,
        out_shape=jax.ShapeDtypeStruct((rows, lane), dtype),
        grid=grid,
        in_specs=[
            pl.BlockSpec(memory_space=pltpu.SMEM),  # [rho, 0.5/rho, 4*rho]
            data_spec,                              # x tile
            data_spec,                              # y tile
            data_spec,                              # M tile
        ],
        out_specs=data_spec,
        compiler_params=pltpu.CompilerParams(
            dimension_semantics=("parallel",),
        ),
    )(scalars, x2, y2, m2)

    out_flat = out2.reshape(-1)
    if needs_pad:
        out_flat = out_flat[:total]
    return out_flat.reshape(orig_shape)


def u_update_ref(x, y, rho1, M):
    """Pure-JAX reference matching the PyTorch module exactly."""
    t1 = rho1 * x - M
    return 0.5 * (1.0 / rho1) * (t1 + jnp.sqrt(t1 ** 2 + 4.0 * y * rho1))


if __name__ == "__main__":
    key = jax.random.PRNGKey(0)
    kx, ky, km = jax.random.split(key, 3)

    # Primary (module-sized) test: NCHW, total divisible by 128 -> no padding.
    N, C, H, W = 2, 4, 16, 16
    x = jax.random.normal(kx, (N, C, H, W), dtype=jnp.float32)
    # y is a (non-negative) observation in the P4IP model; keep it
    # non-negative so the sqrt argument stays well-defined (same assumption
    # as the PyTorch reference).
    y = jnp.abs(jax.random.normal(ky, (N, C, H, W), dtype=jnp.float32))
    M = jax.random.normal(km, (N, C, H, W), dtype=jnp.float32)
    rho1 = jnp.float32(0.7)

    out = jax.block_until_ready(u_update(x, y, rho1, M))
    ref = u_update_ref(x, y, rho1, M)
    assert out.shape == (N, C, H, W)
    assert jnp.allclose(out, ref, atol=1e-5, rtol=1e-5), "mismatch vs reference"

    # Odd-sized test: exercises the padded fallback path.
    shp = (3, 3, 7, 5)
    x2 = jax.random.normal(kx, shp, dtype=jnp.float32)
    y2 = jnp.abs(jax.random.normal(ky, shp, dtype=jnp.float32))
    M2 = jax.random.normal(km, shp, dtype=jnp.float32)
    out2 = jax.block_until_ready(u_update(x2, y2, rho1, M2))
    ref2 = u_update_ref(x2, y2, rho1, M2)
    assert out2.shape == shp
    assert jnp.allclose(out2, ref2, atol=1e-5, rtol=1e-5), "mismatch (ragged)"

    print("KERNEL_OK")
</pallas_src>

<mosaic_0001>
module attributes {stable_mosaic.version = 11 : i64} {
  func.func @_u_update_kernel(%arg0: i32, %arg1: memref<3xf32, #tpu.memory_space<smem>>, %arg2: memref<2x1024xf32, #tpu.memory_space<vmem>>, %arg3: memref<2x1024xf32, #tpu.memory_space<vmem>>, %arg4: memref<2x1024xf32, #tpu.memory_space<vmem>>, %arg5: memref<2x1024xf32, #tpu.memory_space<vmem>>) attributes {dimension_semantics = [#tpu.dimension_semantics<parallel>], iteration_bounds = array<i64: 1>, scalar_prefetch = 0 : i64, scratch_operands = 0 : i64, tpu.core_type = #tpu.core_type<tc>, window_params = [{transform_indices = @transform_0, window_bounds = array<i64: 3>}, {transform_indices = @transform_1, window_bounds = array<i64: 2, 1024>}, {transform_indices = @transform_2, window_bounds = array<i64: 2, 1024>}, {transform_indices = @transform_3, window_bounds = array<i64: 2, 1024>}, {transform_indices = @transform_4, window_bounds = array<i64: 2, 1024>}]} {
    %c0 = arith.constant 0 : index
    %0 = memref.load %arg1[%c0] : memref<3xf32, #tpu.memory_space<smem>>
    %c1 = arith.constant 1 : index
    %1 = memref.load %arg1[%c1] : memref<3xf32, #tpu.memory_space<smem>>
    %c2 = arith.constant 2 : index
    %2 = memref.load %arg1[%c2] : memref<3xf32, #tpu.memory_space<smem>>
    %c0_0 = arith.constant 0 : index
    %c0_1 = arith.constant 0 : index
    %3 = vector.load %arg2[%c0_0, %c0_1] : memref<2x1024xf32, #tpu.memory_space<vmem>>, vector<2x1024xf32>
    %c0_2 = arith.constant 0 : index
    %c0_3 = arith.constant 0 : index
    %4 = vector.load %arg3[%c0_2, %c0_3] : memref<2x1024xf32, #tpu.memory_space<vmem>>, vector<2x1024xf32>
    %c0_4 = arith.constant 0 : index
    %c0_5 = arith.constant 0 : index
    %5 = vector.load %arg4[%c0_4, %c0_5] : memref<2x1024xf32, #tpu.memory_space<vmem>>, vector<2x1024xf32>
    %6 = vector.broadcast %0 : f32 to vector<2x1024xf32>
    %7 = arith.mulf %6, %3 : vector<2x1024xf32>
    %8 = arith.subf %7, %5 : vector<2x1024xf32>
    %9 = arith.mulf %8, %8 : vector<2x1024xf32>
    %10 = vector.broadcast %2 : f32 to vector<2x1024xf32>
    %11 = arith.mulf %10, %4 : vector<2x1024xf32>
    %12 = arith.addf %9, %11 : vector<2x1024xf32>
    %13 = math.sqrt %12 : vector<2x1024xf32>
    %14 = arith.addf %8, %13 : vector<2x1024xf32>
    %15 = vector.broadcast %1 : f32 to vector<2x1024xf32>
    %16 = arith.mulf %15, %14 : vector<2x1024xf32>
    %c0_6 = arith.constant 0 : index
    %c0_7 = arith.constant 0 : index
    %17 = vector.load %arg5[%c0_6, %c0_7] : memref<2x1024xf32, #tpu.memory_space<vmem>>, vector<2x1024xf32>
    tpu.vector_store %arg5[%c0_6, %c0_7], %16 {strides = array<i32>} : memref<2x1024xf32, #tpu.memory_space<vmem>>, vector<2x1024xf32>,
    return
  }
  func.func @transform_0(%arg0: i32) -> i32 {
    %c0_i32 = arith.constant 0 : i32
    %c0_i32_0 = arith.constant 0 : i32
    return %c0_i32 : i32
  }
  func.func @transform_1(%arg0: i32) -> (i32, i32) {
    %c0_i32 = arith.constant 0 : i32
    %c0_i32_0 = arith.constant 0 : i32
    return %arg0, %c0_i32 : i32, i32
  }
  func.func @transform_2(%arg0: i32) -> (i32, i32) {
    %c0_i32 = arith.constant 0 : i32
    %c0_i32_0 = arith.constant 0 : i32
    return %arg0, %c0_i32 : i32, i32
  }
  func.func @transform_3(%arg0: i32) -> (i32, i32) {
    %c0_i32 = arith.constant 0 : i32
    %c0_i32_0 = arith.constant 0 : i32
    return %arg0, %c0_i32 : i32, i32
  }
  func.func @transform_4(%arg0: i32) -> (i32, i32) {
    %c0_i32 = arith.constant 0 : i32
    %c0_i32_0 = arith.constant 0 : i32
    return %arg0, %c0_i32 : i32, i32
  }
}

</mosaic_0001>

<bundles_post_ra>
// kernel: tpu_custom_call.1
= control target key start
LH: loop header
LB: loop body
LE: loop exit
PB: predicated region body
PF: predicated region fallthrough
CT: control target
= control target key end

     0   :  { %9 = vsyncpa [#allocation5], 0  ;;  %s315_s0 = inlined_call_operand.hbm [shape: f32[3], index: 0, kind: input, shape index: {}]   ;;  %s316_s1 = inlined_call_operand.hbm [shape: f32[2,1024], index: 1, kind: input, shape index: {}]   ;;  %s317_s2 = inlined_call_operand.hbm [shape: f32[2,1024], index: 2, kind: input, shape index: {}]   ;;  %s318_s3 = inlined_call_operand.hbm [shape: f32[2,1024], index: 3, kind: input, shape index: {}]   ;;  %s319_s4 = inlined_call_operand.hbm [shape: f32[2,1024], index: 4, kind: output, shape index: {}]  }
   0x1   :  { %10 = vsyncpa [#allocation3], 0 }
   0x2   :  { %11 = vsyncpa [#allocation8], 0  ;;  %s38_s17 = sshll.u32 %s317_s2, 4  ;;  %s39_s17 = int_to_ptr.hbm [resolvable:$true] %s38_s17 }
   0x3   :  { %12 = vsyncpa [#allocation4], 0  ;;  %s270_s18 = smov [#allocation7]   ;;  %s18_s22 = sshll.u32 %s315_s0, 4  ;;  %s19_s22 = int_to_ptr.hbm [resolvable:$true] %s18_s22 }
   0x4   :  { %s40_s19 = sshll.u32 %s270_s18, 4  ;;  %s271_s23 = smov [#allocation2]   ;;  %s41_s19 = int_to_ptr.vmem [resolvable:$true] %s40_s19 }
   0x5   :  { %43 = dma.hbm_to_vmem [thread:$0]  %s39_s17, 256, %s41_s19, [#allocation8]  }
   0x6   :  { %21 = dma.hbm_to_smem %s19_s22, 16, %s271_s23, [#allocation5]  }
   0x7   :  { %s27_s26 = sshll.u32 %s316_s1, 4  ;;  %s272_s27 = smov [#allocation6]   ;;  %s28_s26 = int_to_ptr.hbm [resolvable:$true] %s27_s26 }
   0x8   :  { %s29_s2 = sshll.u32 %s272_s27, 4  ;;  %s49_s30 = sshll.u32 %s318_s3, 4  ;;  %s30_s2 = int_to_ptr.vmem [resolvable:$true] %s29_s2  ;;  %s50_s30 = int_to_ptr.hbm [resolvable:$true] %s49_s30 }
   0x9   :  { %32 = dma.hbm_to_vmem [thread:$0]  %s28_s26, 256, %s30_s2, [#allocation3]  }
   0xa   :  { %s273_s5 = smov [#allocation9]  }
   0xb   :  { %s51_s0 = sshll.u32 %s273_s5, 4  ;;  %s52_s0 = int_to_ptr.vmem [resolvable:$true] %s51_s0 }
   0xc   :  { %54 = dma.hbm_to_vmem [thread:$0]  %s50_s30, 256, %s52_s0, [#allocation8]  }
   0xd   :  { %262 = dma.done.wait [#allocation5], 16  }
   0xe   :  { %263 = vsyncadd [#allocation5], 4294967280 }
   0xf   :  { %264 = dma.done.wait [#allocation3], 256  }
  0x10   :  { %265 = vsyncadd [#allocation3], 4294967040 }
  0x11   :  { %266 = dma.done.wait [#allocation8], 512  }
  0x12   :  { %267 = vsyncadd [#allocation8], 4294966784 }
  0x13   :  { %71 = sfence }
  0x14   :  { %s72_s1 = sld [smem:[#allocation2]]  ;;  %v75_v0 = vld [vmem:[#allocation6] sm:$0xff]  ;;  %v76_v1 = vld [vmem:[#allocation6 + $0x8] sm:$0xff]  ;;  %v77_v2 = vld [vmem:[#allocation7] sm:$0xff]  ;;  %s274_s7 = smov [#allocation10]  }
  0x15   :  { %s144_s6 = sld [smem:[#allocation2 + $0x2]]  ;;  %v79_v3 = vld [vmem:[#allocation9] sm:$0xff]  ;;  %v78_v5 = vld [vmem:[#allocation7 + $0x8] sm:$0xff]  ;;  %v80_v6 = vld [vmem:[#allocation9 + $0x8] sm:$0xff]  ;;  %s129_s8 = sshll.u32 %s274_s7, 4  ;;  %s130_s8 = int_to_ptr.vmem [resolvable:$true] %s129_s8 }
  0x16   :  { %s143_s3 = sld [smem:[#allocation2 + $0x1]]  ;;  %s131_s11 = sshll.u32 %s319_s4, 4  ;;  %s132_s11 = int_to_ptr.hbm [resolvable:$true] %s131_s11 }
  0x1a   :  { %v81_v4 = vstv %s72_s1 }
  0x1b   :  { %v82_v7 = vmul.f32 %v81_v4, %v75_v0  ;;  %v83_v8 = vmul.f32 %v81_v4, %v76_v1  ;;  %v88_v9 = vstv %s144_s6 }
  0x1c   :  { %v89_v11 = vmul.f32 %v88_v9, %v77_v2  ;;  %v90_v13 = vmul.f32 %v88_v9, %v78_v5  ;;  %v119_v36 = vstv %s143_s3 }
  0x1d   :  { %v84_v10 = vsub.f32 %v82_v7, %v79_v3  ;;  %v85_v12 = vsub.f32 %v83_v8, %v80_v6 }
  0x1f   :  { %v86_v14 = vmul.f32 %v84_v10, %v84_v10  ;;  %v87_v15 = vmul.f32 %v85_v12, %v85_v12 }
  0x21   :  { %v91_v16 = vadd.f32 %v89_v11, %v86_v14  ;;  %v92_v17 = vadd.f32 %v90_v13, %v87_v15 }
  0x23   :  { %150 = vrsqrt.f32 %v91_v16  ;;  %vm100_vm0 = vcmp.eq.f32.partialorder %v91_v16, inf  ;;  %v103_v29 = vand.u32 2147483648, %v91_v16  ;;  %vm102_vm1 = vcmp.eq.f32.partialorder %v91_v16, 0.0 }
  0x24   :  { %152 = vrsqrt.f32 %v92_v17  ;;  %vm112_vm2 = vcmp.eq.f32.partialorder %v92_v17, inf  ;;  %v115_v32 = vand.u32 2147483648, %v92_v17  ;;  %vm114_vm3 = vcmp.eq.f32.partialorder %v92_v17, 0.0 }
  0x29   :  { %v151_v18 = vpop.eup %150 }
  0x2a   :  { %v153_v19 = vpop.eup %152  ;;  %v94_v20 = vmul.f32 %v151_v18, %v91_v16 }
  0x2b   :  { %v106_v21 = vmul.f32 %v153_v19, %v92_v17 }
  0x2c   :  { %v95_v22 = vmul.f32 %v151_v18, %v94_v20 }
  0x2d   :  { %v107_v23 = vmul.f32 %v153_v19, %v106_v21 }
  0x2e   :  { %v96_v24 = vmul.f32 0.5, %v95_v22 }
  0x2f   :  { %v108_v25 = vmul.f32 0.5, %v107_v23 }
  0x30   :  { %v97_v26 = vsub.f32 1.5, %v96_v24 }
  0x31   :  { %v109_v27 = vsub.f32 1.5, %v108_v25 }
  0x32   :  { %v98_v28 = vmul.f32 %v151_v18, %v97_v26 }
  0x33   :  { %v110_v30 = vmul.f32 %v153_v19, %v109_v27 }
  0x34   :  { %v99_v31 = vmul.f32 %v98_v28, %v91_v16 }
  0x35   :  { %v111_v33 = vmul.f32 %v110_v30, %v92_v17 }
  0x36   :  { %v101_v34 = vsel %vm100_vm0, %v91_v16, %v99_v31 }
  0x37   :  { %v104_v35 = vsel %vm102_vm1, %v103_v29, %v101_v34  ;;  %v113_v37 = vsel %vm112_vm2, %v92_v17, %v111_v33 }
  0x38   :  { %v117_v38 = vadd.f32 %v104_v35, %v84_v10  ;;  %v116_v39 = vsel %vm114_vm3, %v115_v32, %v113_v37 }
  0x39   :  { %v118_v40 = vadd.f32 %v116_v39, %v85_v12 }
  0x3a   :  { %v120_v41 = vmul.f32 %v119_v36, %v117_v38 }
  0x3b   :  { %v121_v42 = vmul.f32 %v119_v36, %v118_v40 }
  0x3c   :  { %122 = vst [vmem:[#allocation10] sm:$0xff] %v120_v41 }
  0x3d   :  { %123 = vst [vmem:[#allocation10 + $0x8] sm:$0xff] %v121_v42 }
  0x3e   :  { %134 = dma.vmem_to_hbm [thread:$0]  %s130_s8, 256, %s132_s11, [#allocation4]  }
  0x3f   :  { %268 = dma.done.wait [#allocation4], 256  }
  0x40   :  { %269 = vsyncadd [#allocation4], 4294967040 }
  0x41   :  { %139 = vsyncpa [#allocation3], 1 }
  0x42   :  { %140 = vsyncpa [#allocation8], 1 }
  0x43   :  { %141 = vsyncpa [#allocation4], 1 }
  0x44   :  { %142 = vsyncpa [#allocation5], 1 }

</bundles_post_ra>
